<compile_context>
chip_gen: v7x
topology: tpu7x:2x2x1
jax: 0.10.0
libtpu: 0.0.40
codegen_flags: <defaults>
</compile_context>

<pallas_src>
import jax
import jax.numpy as jnp
from jax.experimental import pallas as pl
from jax.experimental.pallas import tpu as pltpu


def _round_up(x, m):
    return ((x + m - 1) // m) * m


def myliner_kernel(x_ref, w_ref, b_ref, o_ref, acc_ref):
    k = pl.program_id(2)

    @pl.when(k == 0)
    def _init():
        # Fold the bias into the accumulator init. Padded N columns carry a
        # zero bias, so this is exact.
        acc_ref[...] = jnp.broadcast_to(
            b_ref[...].astype(jnp.float32), acc_ref.shape
        )

    # Hot path: MXU matmul with f32 accumulation into the resident scratch.
    acc_ref[...] += jnp.dot(
        x_ref[...], w_ref[...], preferred_element_type=jnp.float32
    )

    @pl.when(k == pl.num_programs(2) - 1)
    def _finalize():
        o_ref[...] = acc_ref[...].astype(o_ref.dtype)


def myliner(x, weights, bias, *, tm=512, tn=512, tk=1024, mxu_dtype=None):
    """y = x @ weights + bias, matching torch MyLiner.forward semantics.

    mxu_dtype: optional cast for x/W before the MXU (e.g. jnp.bfloat16 on
    v6e/v7x for ~3x MXU throughput); accumulation stays f32 and the output is
    cast back to x's original dtype.
    """
    B, K = x.shape
    K2, N = weights.shape
    assert K == K2 and bias.shape == (N,)

    out_dtype = x.dtype
    if mxu_dtype is not None:
        x = x.astype(mxu_dtype)
        weights = weights.astype(mxu_dtype)

    in_itemsize = jnp.dtype(x.dtype).itemsize
    out_itemsize = jnp.dtype(out_dtype).itemsize
    b_itemsize = jnp.dtype(bias.dtype).itemsize
    # dtype-aware sublane packing multiple: 8 (f32), 16 (bf16), 32 (int8/fp8)
    sub = max(8, 32 // in_itemsize)

    # ---- tile selection ------------------------------------------------
    if B <= 128:
        tm = _round_up(B, sub)
    else:
        # Padding-aware: pick the candidate that wastes the fewest rows,
        # preferring the larger tile on ties.
        cands = [c for c in (512, 256, 128) if c <= max(tm, 128)]
        tm = min(cands, key=lambda c: (_round_up(B, c) - B, -c))
    tn = min(tn, _round_up(N, 128))
    tk = min(tk, _round_up(K, 128))

    # Megacore guard (v7x has 2 TCs): if the i axis has a single tile, keep at
    # least two lane-dense tiles along j.
    Np0 = _round_up(N, 128)
    if _round_up(B, tm) == tm and Np0 >= 256:
        tn = min(tn, max(128, (Np0 // 2) // 128 * 128))

    # Keep the double-buffered VMEM footprint under ~48 MiB (v7x: 64 MiB
    # physical per TensorCore); shrink tk first, then tn.
    def _vmem_budget(tm_, tn_, tk_):
        return (
            2 * (tm_ * tk_ + tk_ * tn_) * in_itemsize   # x + W, double-buffered
            + 2 * tm_ * tn_ * out_itemsize              # output, double-buffered
            + tm_ * tn_ * 4                             # f32 accumulator
            + 2 * tn_ * b_itemsize                      # bias
        )

    VMEM_CAP = 48 << 20
    while _vmem_budget(tm, tn, tk) > VMEM_CAP and tk > 128:
        tk = max(128, (tk // 2) // 128 * 128)
    while _vmem_budget(tm, tn, tk) > VMEM_CAP and tn > 128:
        tn = max(128, (tn // 2) // 128 * 128)

    Bp, Kp, Np = _round_up(B, tm), _round_up(K, tk), _round_up(N, tn)

    # Zero-padding is exact for a linear layer; these are no-ops when the
    # dims already divide the tiles. TODO(synk): in production, pre-pad
    # weights/bias once at parameter-init time instead of per call.
    xp = x if (Bp, Kp) == (B, K) else jnp.pad(x, ((0, Bp - B), (0, Kp - K)))
    wp = (
        weights
        if (Kp, Np) == (K, N)
        else jnp.pad(weights, ((0, Kp - K), (0, Np - N)))
    )
    bp = (bias if Np == N else jnp.pad(bias, (0, Np - N))).reshape(1, Np)

    grid = (Bp // tm, Np // tn, Kp // tk)
    gi, gj, _ = grid

    # Accurate advisory estimate: x is re-read once per j tile, W once per i.
    cost = pl.CostEstimate(
        flops=2 * Bp * Kp * Np,
        transcendentals=0,
        bytes_accessed=(
            Bp * Kp * in_itemsize * gj     # x (revisited across j)
            + Kp * Np * in_itemsize * gi   # W (revisited across i)
            + Np * b_itemsize              # bias
            + Bp * Np * out_itemsize       # output
        ),
    )

    vmem_limit = max(32 << 20, min(int(_vmem_budget(tm, tn, tk) * 1.5), 56 << 20))

    out = pl.pallas_call(
        myliner_kernel,
        out_shape=jax.ShapeDtypeStruct((Bp, Np), out_dtype),
        grid_spec=pltpu.PrefetchScalarGridSpec(
            num_scalar_prefetch=0,
            grid=grid,
            in_specs=[
                pl.BlockSpec((tm, tk), lambda i, j, k: (i, k)),   # x tile
                pl.BlockSpec((tk, tn), lambda i, j, k: (k, j)),   # W tile
                pl.BlockSpec((1, tn), lambda i, j, k: (0, j)),    # bias tile
            ],
            out_specs=pl.BlockSpec((tm, tn), lambda i, j, k: (i, j)),
            scratch_shapes=[pltpu.VMEM((tm, tn), jnp.float32)],
        ),
        compiler_params=pltpu.CompilerParams(
            dimension_semantics=("parallel", "parallel", "arbitrary"),
            vmem_limit_bytes=vmem_limit,
        ),
        cost_estimate=cost,
    )(xp, wp, bp)

    if (Bp, Np) != (B, N):
        out = out[:B, :N]
    return out


if __name__ == "__main__":
    # NOTE: at these toy shapes plain XLA dot would beat any Pallas kernel;
    # they are kept small only to validate the kernel end-to-end.
    key = jax.random.PRNGKey(0)
    kx, kw, kb = jax.random.split(key, 3)

    batch, in_features, out_features = 8, 32, 64
    x = jax.random.normal(kx, (batch, in_features), dtype=jnp.float32)
    weights = jax.random.normal(kw, (in_features, out_features), dtype=jnp.float32)
    bias = jax.random.normal(kb, (out_features,), dtype=jnp.float32)

    y = myliner(x, weights, bias)
    jax.block_until_ready(y)

    # Reference check in plain JAX.
    y_ref = x @ weights + bias
    assert y.shape == (batch, out_features)
    assert jnp.allclose(y, y_ref, atol=1e-4, rtol=1e-4)
    print("KERNEL_OK")
</pallas_src>

<mosaic_0001>
module attributes {stable_mosaic.version = 11 : i64} {
  func.func @myliner_kernel(%arg0: i32, %arg1: i32, %arg2: i32, %arg3: memref<8x128xf32, #tpu.memory_space<vmem>>, %arg4: memref<128x128xf32, #tpu.memory_space<vmem>>, %arg5: memref<1x128xf32, #tpu.memory_space<vmem>>, %arg6: memref<8x128xf32, #tpu.memory_space<vmem>>, %arg7: memref<8x128xf32, #tpu.memory_space<vmem>>) attributes {dimension_semantics = [#tpu.dimension_semantics<parallel>, #tpu.dimension_semantics<parallel>, #tpu.dimension_semantics<arbitrary>], iteration_bounds = array<i64: 1, 1, 1>, scalar_prefetch = 0 : i64, scratch_operands = 1 : i64, tpu.core_type = #tpu.core_type<tc>, window_params = [{transform_indices = @transform_0, window_bounds = array<i64: 8, 128>}, {transform_indices = @transform_1, window_bounds = array<i64: 128, 128>}, {transform_indices = @transform_2, window_bounds = array<i64: 1, 128>}, {transform_indices = @transform_3, window_bounds = array<i64: 8, 128>}]} {
    %c0_i32 = arith.constant 0 : i32
    %0 = arith.cmpi eq, %arg2, %c0_i32 : i32
    %1 = arith.extui %0 : i1 to i32
    %c0_i32_0 = arith.constant 0 : i32
    %2 = arith.cmpi ne, %1, %c0_i32_0 : i32
    scf.if %2 {
      %c0_10 = arith.constant 0 : index
      %c0_11 = arith.constant 0 : index
      %12 = vector.load %arg5[%c0_10, %c0_11] : memref<1x128xf32, #tpu.memory_space<vmem>>, vector<1x128xf32>
      %13 = vector.shape_cast %12 : vector<1x128xf32> to vector<1x128xf32>
      %14 = vector.broadcast %13 : vector<1x128xf32> to vector<8x128xf32>
      %c0_12 = arith.constant 0 : index
      %c0_13 = arith.constant 0 : index
      %15 = vector.load %arg7[%c0_12, %c0_13] : memref<8x128xf32, #tpu.memory_space<vmem>>, vector<8x128xf32>
      tpu.vector_store %arg7[%c0_12, %c0_13], %14 {strides = array<i32>} : memref<8x128xf32, #tpu.memory_space<vmem>>, vector<8x128xf32>,
    } else {
    }
    %c0 = arith.constant 0 : index
    %c0_1 = arith.constant 0 : index
    %3 = vector.load %arg7[%c0, %c0_1] : memref<8x128xf32, #tpu.memory_space<vmem>>, vector<8x128xf32>
    %c0_2 = arith.constant 0 : index
    %c0_3 = arith.constant 0 : index
    %4 = vector.load %arg3[%c0_2, %c0_3] : memref<8x128xf32, #tpu.memory_space<vmem>>, vector<8x128xf32>
    %c0_4 = arith.constant 0 : index
    %c0_5 = arith.constant 0 : index
    %5 = vector.load %arg4[%c0_4, %c0_5] : memref<128x128xf32, #tpu.memory_space<vmem>>, vector<128x128xf32>
    %cst = arith.constant dense<0.000000e+00> : vector<8x128xf32>
    %6 = tpu.matmul %4, %5, %cst {dimension_numbers = #tpu.dot_dimension_numbers<[1], [0], [0], [1], [0, 0, 1, 1], [], []>} : vector<8x128xf32>, vector<128x128xf32>, vector<8x128xf32> -> vector<8x128xf32>
    %7 = arith.addf %3, %6 : vector<8x128xf32>
    %c0_6 = arith.constant 0 : index
    %c0_7 = arith.constant 0 : index
    %8 = vector.load %arg7[%c0_6, %c0_7] : memref<8x128xf32, #tpu.memory_space<vmem>>, vector<8x128xf32>
    tpu.vector_store %arg7[%c0_6, %c0_7], %7 {strides = array<i32>} : memref<8x128xf32, #tpu.memory_space<vmem>>, vector<8x128xf32>,
    %c0_i32_8 = arith.constant 0 : i32
    %9 = arith.cmpi eq, %arg2, %c0_i32_8 : i32
    %10 = arith.extui %9 : i1 to i32
    %c0_i32_9 = arith.constant 0 : i32
    %11 = arith.cmpi ne, %10, %c0_i32_9 : i32
    scf.if %11 {
      %c0_10 = arith.constant 0 : index
      %c0_11 = arith.constant 0 : index
      %12 = vector.load %arg7[%c0_10, %c0_11] : memref<8x128xf32, #tpu.memory_space<vmem>>, vector<8x128xf32>
      %c0_12 = arith.constant 0 : index
      %c0_13 = arith.constant 0 : index
      %13 = vector.load %arg6[%c0_12, %c0_13] : memref<8x128xf32, #tpu.memory_space<vmem>>, vector<8x128xf32>
      tpu.vector_store %arg6[%c0_12, %c0_13], %12 {strides = array<i32>} : memref<8x128xf32, #tpu.memory_space<vmem>>, vector<8x128xf32>,
    } else {
    }
    return
  }
  func.func @transform_0(%arg0: i32, %arg1: i32, %arg2: i32) -> (i32, i32) {
    %c0_i32 = arith.constant 0 : i32
    return %arg0, %arg2 : i32, i32
  }
  func.func @transform_1(%arg0: i32, %arg1: i32, %arg2: i32) -> (i32, i32) {
    %c0_i32 = arith.constant 0 : i32
    return %arg2, %arg1 : i32, i32
  }
  func.func @transform_2(%arg0: i32, %arg1: i32, %arg2: i32) -> (i32, i32) {
    %c0_i32 = arith.constant 0 : i32
    %c0_i32_0 = arith.constant 0 : i32
    return %c0_i32, %arg1 : i32, i32
  }
  func.func @transform_3(%arg0: i32, %arg1: i32, %arg2: i32) -> (i32, i32) {
    %c0_i32 = arith.constant 0 : i32
    return %arg0, %arg1 : i32, i32
  }
}

</mosaic_0001>

<bundles_post_ra>
// kernel: tpu_custom_call.1
= control target key start
LH: loop header
LB: loop body
LE: loop exit
PB: predicated region body
PF: predicated region fallthrough
CT: control target
= control target key end

     0   :  { %8 = vsyncpa [#allocation4], 0  ;;  %s395_s0 = inlined_call_operand.hbm [shape: f32[8,128], index: 0, kind: input, shape index: {}]   ;;  %s396_s1 = inlined_call_operand.hbm [shape: f32[128,128], index: 1, kind: input, shape index: {}]   ;;  %s397_s2 = inlined_call_operand.vmem [shape: f32[1,128], index: 2, kind: input, shape index: {}]   ;;  %s398_s3 = inlined_call_operand.hbm [shape: f32[8,128], index: 3, kind: output, shape index: {}]  }
   0x1   :  { %9 = vsyncpa [#allocation7], 0 }
   0x2   :  { %10 = vsyncpa [#allocation5], 0  ;;  %s321_s12 = smov [#allocation3]   ;;  %s322_s14 = smov [#allocation6]  }
   0x3   :  { %s17_s13 = sshll.u32 %s321_s12, 4  ;;  %s26_s15 = sshll.u32 %s322_s14, 4  ;;  %s18_s13 = int_to_ptr.vmem [resolvable:$true] %s17_s13  ;;  %s349_s15 = int_to_ptr.vmem [resolvable:$true] %s26_s15 }
   0x4   :  { %s249_s18 = scalar_lea.hbm %s395_s0, 128 }
   0x5   :  { %p250_p0 = scmp.ne.s32.totalorder %s395_s0, %s249_s18  ;;  %p253_p1 = scmp.lt.u32.totalorder %s249_s18, %s395_s0 }
   0x7   :  { %p255_p2 = pnand %p253_p1, %p250_p0 }
   0x9   :  { %258 = shalt.err (!%p255_p2)
}
   0xa   :  { %s259_s23 = scalar_lea.vmem %s18_s13, 128  ;;  %p264_p4 = scmp.lt.s32.totalorder %s18_s13, %s18_s13 }
   0xb   :  { %p260_p3 = scmp.ne.s32.totalorder %s18_s13, %s259_s23  ;;  %p265_p5 = scmp.lt.s32.totalorder %s259_s23, %s259_s23 }
   0xd   :  { %p266_p6 = por %p265_p5, %p264_p4 }
   0xf   :  { %p267_p7 = pnand %p266_p6, %p260_p3 }
  0x11   :  { %270 = shalt.err (!%p267_p7)
}
  0x12   :  { %20 = dma.hbm_to_vmem [thread:$0]  %s395_s0, 128, %s18_s13, [#allocation4]  }
  0x13   :  { %s271_s28 = scalar_lea.hbm %s396_s1, 2048 }
  0x14   :  { %p272_p8 = scmp.ne.s32.totalorder %s396_s1, %s271_s28  ;;  %p275_p9 = scmp.lt.u32.totalorder %s271_s28, %s396_s1 }
  0x16   :  { %p277_p10 = pnand %p275_p9, %p272_p8 }
  0x18   :  { %280 = shalt.err (!%p277_p10)
}
  0x19   :  { %s281_s6 = scalar_lea.vmem %s349_s15, 2048  ;;  %p286_p12 = scmp.lt.s32.totalorder %s349_s15, %s349_s15 }
  0x1a   :  { %p282_p11 = scmp.ne.s32.totalorder %s349_s15, %s281_s6  ;;  %p287_p13 = scmp.lt.s32.totalorder %s281_s6, %s281_s6 }
  0x1c   :  { %p288_p0 = por %p287_p13, %p286_p12 }
  0x1e   :  { %p289_p1 = pnand %p288_p0, %p282_p11 }
  0x20   :  { %292 = shalt.err (!%p289_p1)
}
  0x21   :  { %s323_s0 = smov 128   ;;  %s324_s7 = smov 8  }
  0x22   :  { %32 = dma.hbm_to_vmem [thread:$0]  %s396_s1, 2048, %s349_s15, [#allocation7], %s323_s0, %s323_s0, %s324_s7  }
  0x23   :  { %315 = dma.done.wait [#allocation4], 128  }
  0x24   :  { %316 = vsyncadd [#allocation4], 4294967168 }
  0x25   :  { %317 = dma.done.wait [#allocation7], 2048  }
  0x26   :  { %318 = vsyncadd [#allocation7], 4294965248  ;;  %v325_v0 = vmov 0.0|0.0   ;;  %vm326_vm0 = vmmov 0   ;;  %v327_v1 = vmov 0.0   ;;  %v55_v2 = vld [vmem:[#allocation6] sm:$0xff] }
  0x27   :  { %217 = vmatprep.subr.bf16.mxu0 %v325_v0  ;;  %214 = vmatprep.mubr.msk.f32.mxu0 %vm326_vm0, %v327_v1  ;;  %v56_v3 = vld [vmem:[#allocation6 + $0x8] sm:$0xff]  ;;  %v57_v4 = vld [vmem:[#allocation6 + $0x10] sm:$0xff]  ;;  %v58_v6 = vld [vmem:[#allocation6 + $0x18] sm:$0xff]  ;;  %s328_s11 = smov [#allocation8]  }
  0x28   :  { %v218_v5 = vpack.c.bf16 %v56_v3, %v55_v2  ;;  %v221_v7 = vpack.c.bf16 %v58_v6, %v57_v4  ;;  %v59_v8 = vld [vmem:[#allocation6 + $0x20] sm:$0xff]  ;;  %v60_v9 = vld [vmem:[#allocation6 + $0x28] sm:$0xff]  ;;  %v61_v11 = vld [vmem:[#allocation6 + $0x30] sm:$0xff]  ;;  %s154_s12 = sshll.u32 %s328_s11, 4  ;;  %s155_s12 = int_to_ptr.vmem [resolvable:$true] %s154_s12 }
  0x29   :  { %v224_v10 = vpack.c.bf16 %v60_v9, %v59_v8  ;;  %v62_v12 = vld [vmem:[#allocation6 + $0x38] sm:$0xff]  ;;  %v63_v14 = vld [vmem:[#allocation6 + $0x40] sm:$0xff]  ;;  %v64_v15 = vld [vmem:[#allocation6 + $0x48] sm:$0xff]  ;;  %s293_s13 = scalar_lea.vmem %s155_s12, 128  ;;  %p298_p3 = scmp.lt.s32.totalorder %s155_s12, %s155_s12 }
  0x2a   :  { %219 = vmatpush3.bf16.msra.mxu0 %v218_v5  ;;  %v227_v13 = vpack.c.bf16 %v62_v12, %v61_v11  ;;  %v230_v16 = vpack.c.bf16 %v64_v15, %v63_v14  ;;  %v65_v17 = vld [vmem:[#allocation6 + $0x50] sm:$0xff]  ;;  %v66_v18 = vld [vmem:[#allocation6 + $0x58] sm:$0xff]  ;;  %v67_v20 = vld [vmem:[#allocation6 + $0x60] sm:$0xff]  ;;  %p294_p2 = scmp.ne.s32.totalorder %s155_s12, %s293_s13  ;;  %p299_p4 = scmp.lt.s32.totalorder %s293_s13, %s293_s13 }
  0x2b   :  { %220 = vmatprep.subr.bf16.mxu0 %v325_v0  ;;  %v233_v19 = vpack.c.bf16 %v66_v18, %v65_v17  ;;  %v68_v21 = vld [vmem:[#allocation6 + $0x68] sm:$0xff]  ;;  %v69_v23 = vld [vmem:[#allocation6 + $0x70] sm:$0xff]  ;;  %v70_v24 = vld [vmem:[#allocation6 + $0x78] sm:$0xff] }
  0x2c   :  { %v236_v22 = vpack.c.bf16 %v68_v21, %v67_v20  ;;  %v239_v25 = vpack.c.bf16 %v70_v24, %v69_v23  ;;  %v54_v26 = vld [vmem:[#allocation3] sm:$0xff]  ;;  %p300_p5 = por %p299_p4, %p298_p3 }
  0x2d   :  { %v164_v27 = vld [vmem:[%s397_s2] ss:$0 sm:$0xff] }
  0x2e   :  { %222 = vmatpush3.bf16.msra.mxu0 %v221_v7  ;;  %p301_p6 = pnand %p300_p5, %p294_p2 }
  0x2f   :  { %223 = vmatprep.subr.bf16.mxu0 %v325_v0 }
  0x32   :  { %225 = vmatpush3.bf16.msra.mxu0 %v224_v10 }
  0x33   :  { %226 = vmatprep.subr.bf16.mxu0 %v325_v0 }
  0x36   :  { %228 = vmatpush3.bf16.msra.mxu0 %v227_v13 }
  0x37   :  { %229 = vmatprep.subr.bf16.mxu0 %v325_v0 }
  0x3a   :  { %231 = vmatpush3.bf16.msra.mxu0 %v230_v16 }
  0x3b   :  { %232 = vmatprep.subr.bf16.mxu0 %v325_v0 }
  0x3e   :  { %234 = vmatpush3.bf16.msra.mxu0 %v233_v19 }
  0x3f   :  { %235 = vmatprep.subr.bf16.mxu0 %v325_v0 }
  0x42   :  { %237 = vmatpush3.bf16.msra.mxu0 %v236_v22 }
  0x43   :  { %238 = vmatprep.subr.bf16.mxu0 %v325_v0 }
  0x46   :  { %240 = vmatpush3.bf16.msra.mxu0 %v239_v25 }
  0x49   :  { %215 = vmatmul.mubr.f32.vlgmr.msra.gmra.mrb[0].mxu0 %v54_v26 }
 0x11c   :  { %v137_v28 = vpop.f32.mrb[0].mxu0 }
 0x11d   :  { %v141_v29 = vadd.f32 %v164_v27, %v137_v28  ;;  %v216_v30 = vpop.f32.mrb[1].mxu0 }
 0x11f   :  { %147 = vst [vmem:[#allocation8] sm:$0xff] %v141_v29 }
 0x120   :  { %304 = shalt.err (!%p301_p6)
}
 0x121   :  { %s305_s16 = scalar_lea.hbm %s398_s3, 128 }
 0x122   :  { %p306_p7 = scmp.ne.s32.totalorder %s398_s3, %s305_s16  ;;  %p309_p8 = scmp.lt.u32.totalorder %s305_s16, %s398_s3 }
 0x124   :  { %p311_p9 = pnand %p309_p8, %p306_p7 }
 0x126   :  { %314 = shalt.err (!%p311_p9)
}
 0x127   :  { %157 = dma.vmem_to_hbm [thread:$0]  %s155_s12, 128, %s398_s3, [#allocation5]  }
 0x128   :  { %319 = dma.done.wait [#allocation5], 128  }
 0x129   :  { %320 = vsyncadd [#allocation5], 4294967168 }
 0x12a   :  { %161 = vsyncpa [#allocation4], 1 }
 0x12b   :  { %162 = vsyncpa [#allocation7], 1 }
 0x12c   :  { %163 = vsyncpa [#allocation5], 1 }

</bundles_post_ra>
